<compile_context>
chip_gen: v6e
topology: v6e:2x2x1
jax: 0.10.0
libtpu: 0.0.40
codegen_flags: <defaults>
</compile_context>

<pallas_src>
import jax
import jax.numpy as jnp
from jax.experimental import pallas as pl
from jax.experimental.pallas import tpu as pltpu

EPS = 1e-5
LANE_TILE = 128  # independent rows packed along the lane axis per grid step


def _layernorm_kernel(x_ref, w_ref, b_ref, o_ref):
    # x_ref/o_ref: (D, LANE_TILE) f32 -- normalized axis D on sublanes,
    #              independent rows on lanes (lane-dense, unmasked stores).
    # w_ref/b_ref: (D, 1) f32, broadcast across lanes by the VPU.
    x = x_ref[...]
    d = x.shape[0]
    inv_d = 1.0 / d

    # Two-pass reduction over the sublane axis (tile is resident in vregs,
    # so the second pass is essentially free and numerically safer).
    mean = jnp.sum(x, axis=0, keepdims=True) * inv_d          # (1, LANE_TILE)
    xc = x - mean                                             # (D, LANE_TILE)
    var = jnp.sum(xc * xc, axis=0, keepdims=True) * inv_d     # biased (torch)
    inv = jax.lax.rsqrt(var + EPS)                            # EUP rsqrt

    o_ref[...] = xc * inv * w_ref[...] + b_ref[...]


def layernorm_lastdims(x, weight, bias):
    """LayerNorm over the trailing dims of x matching weight.shape (f32)."""
    norm_ndim = weight.ndim
    d = 1
    for s in x.shape[-norm_ndim:]:
        d *= s
    n = 1
    for s in x.shape[:-norm_ndim]:
        n *= s

    # (N, D) -> (D, N): normalized axis on sublanes, rows on lanes.
    xt = x.reshape(n, d).T
    # Pad rows to a multiple of 128 lanes: full unmasked stores + parallel grid.
    n_pad = pl.cdiv(n, LANE_TILE) * LANE_TILE
    if n_pad != n:
        xt = jnp.pad(xt, ((0, 0), (0, n_pad - n)))

    w_col = weight.reshape(d, 1).astype(jnp.float32)
    b_col = bias.reshape(d, 1).astype(jnp.float32)

    out_t = pl.pallas_call(
        _layernorm_kernel,
        out_shape=jax.ShapeDtypeStruct((d, n_pad), jnp.float32),
        grid=(n_pad // LANE_TILE,),
        in_specs=[
            pl.BlockSpec((d, LANE_TILE), lambda i: (0, i)),
            pl.BlockSpec((d, 1), lambda i: (0, 0)),
            pl.BlockSpec((d, 1), lambda i: (0, 0)),
        ],
        out_specs=pl.BlockSpec((d, LANE_TILE), lambda i: (0, i)),
        compiler_params=pltpu.CompilerParams(
            dimension_semantics=("parallel",),      # v7x: split lane tiles over 2 TCs
            vmem_limit_bytes=32 * 1024 * 1024,      # fits v7x's smaller scoped VMEM
        ),
    )(xt, w_col, b_col)

    # Drop lane padding, restore (N, D) then original shape.
    return out_t[:, :n].T.reshape(x.shape)


if __name__ == "__main__":
    # Deterministic parameters, matching the PyTorch module's __init__.
    weight = jnp.array(
        [[[3.0, 2.0, 4.0], [2.0, 3.0, 3.0]],
         [[3.0, 2.0, 4.0], [2.0, 3.0, 3.0]]], dtype=jnp.float32)
    bias = jnp.array(
        [[[0.5, 0.4, 0.3], [0.2, 0.4, 0.3]],
         [[0.5, 0.4, 0.3], [0.2, 0.4, 0.3]]], dtype=jnp.float32)

    key = jax.random.PRNGKey(0)
    x = jax.random.normal(key, (2, 5, 2, 2, 3), dtype=jnp.float32)

    out = layernorm_lastdims(x, weight, bias)
    out = jax.block_until_ready(out)

    # Pure-JAX reference (same semantics as torch.nn.LayerNorm([2, 2, 3])).
    mean = jnp.mean(x, axis=(-3, -2, -1), keepdims=True)
    var = jnp.mean((x - mean) ** 2, axis=(-3, -2, -1), keepdims=True)
    ref = (x - mean) / jnp.sqrt(var + EPS) * weight + bias
    assert jnp.allclose(out, ref, atol=1e-5, rtol=1e-5), \
        float(jnp.max(jnp.abs(out - ref)))

    print("KERNEL_OK")
</pallas_src>

<mosaic_0001>
module attributes {stable_mosaic.version = 11 : i64} {
  func.func @_layernorm_kernel(%arg0: i32, %arg1: memref<12x128xf32, #tpu.memory_space<vmem>>, %arg2: memref<12x1xf32, #tpu.memory_space<vmem>>, %arg3: memref<12x1xf32, #tpu.memory_space<vmem>>, %arg4: memref<12x128xf32, #tpu.memory_space<vmem>>) attributes {dimension_semantics = [#tpu.dimension_semantics<parallel>], iteration_bounds = array<i64: 1>, scalar_prefetch = 0 : i64, scratch_operands = 0 : i64, tpu.core_type = #tpu.core_type<tc>, window_params = [{transform_indices = @transform_0, window_bounds = array<i64: 12, 128>}, {pipeline_mode = #tpu.pipeline_mode<synchronous>, transform_indices = @transform_1, window_bounds = array<i64: 12, 1>}, {pipeline_mode = #tpu.pipeline_mode<synchronous>, transform_indices = @transform_2, window_bounds = array<i64: 12, 1>}, {transform_indices = @transform_3, window_bounds = array<i64: 12, 128>}]} {
    %c0 = arith.constant 0 : index
    %c0_0 = arith.constant 0 : index
    %0 = vector.load %arg1[%c0, %c0_0] : memref<12x128xf32, #tpu.memory_space<vmem>>, vector<12x128xf32>
    %cst = arith.constant dense<0.000000e+00> : vector<128xf32>
    %1 = vector.multi_reduction <add>, %0, %cst [0] : vector<12x128xf32> to vector<128xf32>
    %2 = vector.shape_cast %1 : vector<128xf32> to vector<1x128xf32>
    %cst_1 = arith.constant 0.0833333358 : f32
    %3 = vector.broadcast %cst_1 : f32 to vector<1x128xf32>
    %4 = arith.mulf %2, %3 : vector<1x128xf32>
    %5 = vector.broadcast %4 : vector<1x128xf32> to vector<12x128xf32>
    %6 = arith.subf %0, %5 : vector<12x128xf32>
    %7 = arith.mulf %6, %6 : vector<12x128xf32>
    %cst_2 = arith.constant dense<0.000000e+00> : vector<128xf32>
    %8 = vector.multi_reduction <add>, %7, %cst_2 [0] : vector<12x128xf32> to vector<128xf32>
    %9 = vector.shape_cast %8 : vector<128xf32> to vector<1x128xf32>
    %cst_3 = arith.constant 0.0833333358 : f32
    %10 = vector.broadcast %cst_3 : f32 to vector<1x128xf32>
    %11 = arith.mulf %9, %10 : vector<1x128xf32>
    %cst_4 = arith.constant 9.99999974E-6 : f32
    %12 = vector.broadcast %cst_4 : f32 to vector<1x128xf32>
    %13 = arith.addf %11, %12 : vector<1x128xf32>
    %14 = math.rsqrt %13 : vector<1x128xf32>
    %15 = vector.broadcast %14 : vector<1x128xf32> to vector<12x128xf32>
    %16 = arith.mulf %6, %15 : vector<12x128xf32>
    %c0_5 = arith.constant 0 : index
    %c0_6 = arith.constant 0 : index
    %17 = vector.load %arg2[%c0_5, %c0_6] : memref<12x1xf32, #tpu.memory_space<vmem>>, vector<12x1xf32>
    %18 = vector.broadcast %17 : vector<12x1xf32> to vector<12x128xf32>
    %19 = arith.mulf %16, %18 : vector<12x128xf32>
    %c0_7 = arith.constant 0 : index
    %c0_8 = arith.constant 0 : index
    %20 = vector.load %arg3[%c0_7, %c0_8] : memref<12x1xf32, #tpu.memory_space<vmem>>, vector<12x1xf32>
    %21 = vector.broadcast %20 : vector<12x1xf32> to vector<12x128xf32>
    %22 = arith.addf %19, %21 : vector<12x128xf32>
    %c0_9 = arith.constant 0 : index
    %c0_10 = arith.constant 0 : index
    %23 = vector.load %arg4[%c0_9, %c0_10] : memref<12x128xf32, #tpu.memory_space<vmem>>, vector<12x128xf32>
    tpu.vector_store %arg4[%c0_9, %c0_10], %22 {strides = array<i32>} : memref<12x128xf32, #tpu.memory_space<vmem>>, vector<12x128xf32>,
    return
  }
  func.func @transform_0(%arg0: i32) -> (i32, i32) {
    %c0_i32 = arith.constant 0 : i32
    %c0_i32_0 = arith.constant 0 : i32
    return %c0_i32, %arg0 : i32, i32
  }
  func.func @transform_1(%arg0: i32) -> (i32, i32) {
    %c0_i32 = arith.constant 0 : i32
    %c0_i32_0 = arith.constant 0 : i32
    %c0_i32_1 = arith.constant 0 : i32
    return %c0_i32, %c0_i32_0 : i32, i32
  }
  func.func @transform_2(%arg0: i32) -> (i32, i32) {
    %c0_i32 = arith.constant 0 : i32
    %c0_i32_0 = arith.constant 0 : i32
    %c0_i32_1 = arith.constant 0 : i32
    return %c0_i32, %c0_i32_0 : i32, i32
  }
  func.func @transform_3(%arg0: i32) -> (i32, i32) {
    %c0_i32 = arith.constant 0 : i32
    %c0_i32_0 = arith.constant 0 : i32
    return %c0_i32, %arg0 : i32, i32
  }
}

</mosaic_0001>

<bundles_post_ra>
// kernel: tpu_custom_call.1
= control target key start
LH: loop header
LB: loop body
LE: loop exit
PB: predicated region body
PF: predicated region fallthrough
CT: control target
= control target key end

     0   :  { %v120_v2 = vmov 0   ;;  %s165_s0 = inlined_call_operand.vmem [shape: f32[12,128], index: 0, kind: input, shape index: {}]   ;;  %s166_s1 = inlined_call_operand.vmem [shape: f32[12,1], index: 1, kind: input, shape index: {}]   ;;  %s167_s2 = inlined_call_operand.vmem [shape: f32[12,1], index: 2, kind: input, shape index: {}]   ;;  %s168_s3 = inlined_call_operand.hbm [shape: f32[12,128], index: 3, kind: output, shape index: {}]  }
   0x1   :  { %v58_v0 = vld [vmem:[%s167_s2] sm:$0xff]  ;;  %95 = vset.pattern.permute.xlu1 %v120_v2  ;;  %94 = vset.pattern.permute.xlu0 %v120_v2 }
   0x2   :  { %v44_v1 = vld [vmem:[%s166_s1] sm:$0xff]  ;;  %62 = vperm.xlu1 %95, %v58_v0  }
   0x3   :  { %48 = vperm.xlu0 %94, %v44_v1  }
   0x4   :  { %8 = vsyncpa [#allocation3], 0  ;;  %v59_v3 = vld [vmem:[%s167_s2 + $0x8] sm:$0xf]  ;;  %vm17_vm0 = vcmask 1043456   ;;  %v15_v6 = vld [vmem:[%s165_s0] sm:$0xff] }
   0x5   :  { %v45_v4 = vld [vmem:[%s166_s1 + $0x8] sm:$0xf] }
   0x6   :  { %67 = vperm.xlu1 %95, %v59_v3   ;;  %v16_v5 = vld [vmem:[%s165_s0 + $0x8] sm:$0xf]  ;;  %s121_s0 = smov [#allocation2]  }
   0x7   :  { %53 = vperm.xlu0 %94, %v45_v4   ;;  %v18_v7 = vsel %vm17_vm0, %v16_v5, 0.0  ;;  %s79_s1 = sshll.u32 %s121_s0, 4  ;;  %s80_s1 = int_to_ptr.vmem [resolvable:$true] %s79_s1 }
   0x8   :  { %v19_v8 = vadd.f32 %v18_v7, %v15_v6  ;;  %s98_s2 = scalar_lea.vmem %s80_s1, 256  ;;  %p103_p1 = scmp.lt.s32.totalorder %s80_s1, %s80_s1 }
   0x9   :  { %p99_p0 = scmp.ne.s32.totalorder %s80_s1, %s98_s2  ;;  %p104_p2 = scmp.lt.s32.totalorder %s98_s2, %s98_s2 }
   0xa   :  { %v20_v9 = vrot.slane %v19_v8, 4 }
   0xb   :  { %p105_p3 = por %p104_p2, %p103_p1 }
   0xc   :  { %v21_v10 = vadd.f32 %v20_v9, %v19_v8 }
   0xd   :  { %p106_p4 = pnand %p105_p3, %p99_p0 }
   0xe   :  { %v22_v11 = vrot.slane %v21_v10, 2 }
  0x10   :  { %v23_v12 = vadd.f32 %v22_v11, %v21_v10 }
  0x12   :  { %v24_v13 = vrot.slane %v23_v12, 1 }
  0x14   :  { %v25_v14 = vadd.f32 %v24_v13, %v23_v12 }
  0x16   :  { %v26_v15 = vmul.f32 0.083333336, %v25_v14 }
  0x18   :  { %v28_v16 = vsub.f32 %v16_v5, %v26_v15  ;;  %v27_v17 = vsub.f32 %v15_v6, %v26_v15 }
  0x1a   :  { %v30_v18 = vmul.f32 %v28_v16, %v28_v16  ;;  %v29_v19 = vmul.f32 %v27_v17, %v27_v17 }
  0x1c   :  { %v31_v20 = vsel %vm17_vm0, %v30_v18, 0.0 }
  0x1d   :  { %v32_v21 = vadd.f32 %v31_v20, %v29_v19 }
  0x1f   :  { %v33_v22 = vrot.slane %v32_v21, 4 }
  0x21   :  { %v34_v23 = vadd.f32 %v33_v22, %v32_v21 }
  0x23   :  { %v35_v24 = vrot.slane %v34_v23, 2 }
  0x25   :  { %v36_v25 = vadd.f32 %v35_v24, %v34_v23 }
  0x27   :  { %v37_v26 = vrot.slane %v36_v25, 1 }
  0x29   :  { %v38_v27 = vadd.f32 %v37_v26, %v36_v25 }
  0x2b   :  { %v39_v28 = vmul.f32 0.083333336, %v38_v27 }
  0x2d   :  { %v40_v29 = vadd.f32 1e-05, %v39_v28 }
  0x2f   :  { %96 = vrsqrt.f32 %v40_v29 }
  0x3c   :  { %v97_v30 = vpop.eup %96 }
  0x3d   :  { %v42_v31 = vmul.f32 %v97_v30, %v27_v17  ;;  %v43_v35 = vmul.f32 %v97_v30, %v28_v16 }
  0x7d   :  { %v63_v32 = vpop.permute.xlu1 %62 }
  0x7e   :  { %v49_v33 = vpop.permute.xlu0 %48 }
  0x7f   :  { %v56_v34 = vmul.f32 %v49_v33, %v42_v31 }
  0x81   :  { %v70_v36 = vadd.f32 %v63_v32, %v56_v34  ;;  %v68_v39 = vpop.permute.xlu1 %67 }
  0x82   :  { %v54_v37 = vpop.permute.xlu0 %53 }
  0x83   :  { %72 = vst [vmem:[#allocation2] sm:$0xff] %v70_v36  ;;  %v57_v38 = vmul.f32 %v54_v37, %v43_v35 }
  0x85   :  { %v71_v40 = vadd.f32 %v68_v39, %v57_v38 }
  0x87   :  { %73 = vst [vmem:[#allocation2 + $0x8] sm:$0xf] %v71_v40 }
  0x88   :  { %109 = shalt.err (!%p106_p4)
}
  0x89   :  { %s122_s24 = smov 128   ;;  %s123_s25 = smov 8  }
  0x8a   :  { %85 = dma.vmem_to_hbm [thread:$0]  %s80_s1, 256, %s168_s3, [#allocation3], %s122_s24, %s122_s24, %s123_s25  }
  0x8b   :  { %118 = dma.done.wait [#allocation3], 256  }
  0x8c   :  { %119 = vsyncadd [#allocation3], 4294967040 }
  0x8d   :  { %89 = vsyncpa [#allocation3], 1 }

</bundles_post_ra>
